<compile_context>
chip_gen: v7x
topology: tpu7x:2x2x1
jax: 0.10.0
libtpu: 0.0.40
codegen_flags: <defaults>
</compile_context>

<pallas_src>
import math

import jax
import jax.numpy as jnp
from jax.experimental import pallas as pl
from jax.experimental.pallas import tpu as pltpu


# ----------------------------------------------------------------------------
# VMEM budgeting / tile selection helpers (generation aware)
# ----------------------------------------------------------------------------
def _vmem_limit_bytes():
    """~96 MiB on 128 MiB parts (v5e/v6e), ~48 MiB on 64 MiB parts (v7x)."""
    cap = 64 * 1024 * 1024
    try:
        cap = int(pltpu.get_tpu_info().vmem_capacity_bytes)
    except Exception:
        pass
    return min((cap * 3) // 4, 100 * 1024 * 1024)


def _compiler_params(dimension_semantics, vmem_limit):
    return pltpu.CompilerParams(
        dimension_semantics=dimension_semantics,
        vmem_limit_bytes=vmem_limit,
    )


def _tile_candidates(dim, cap=None):
    """Candidate tiles for a (sub-)batch block dim: multiples of 8, or full dim."""
    cap = dim if cap is None else max(1, min(cap, dim))
    mult8 = list(range(8, cap + 1, 8))
    divs = [t for t in mult8 if dim % t == 0]
    cands = set(divs if divs else mult8)
    if dim <= cap:
        cands.add(dim)
    if not cands:
        cands = {dim}
    return sorted(cands, reverse=True)


def _vocab_tile_candidates(V):
    """Lane-aligned vocab tiles (multiples of 128) or the full vocab if modest."""
    cands = {t for t in (4096, 2048, 1024, 512, 256, 128) if t < V}
    if V <= 4096 or not cands:
        cands.add(V)
    return sorted(cands, reverse=True)


def _fused_vmem_bytes(tb, tn, S, H, E, wb):
    """Conservative VMEM footprint of the fused step kernel (everything 2x buffered)."""
    f32 = 4
    pipelined = (
        tb * H * f32 + tb * E * f32            # hidden, embedding rows
        + 2 * tb * S * H * wb                  # enc_proj + enc (batch-first)
        + H * H * wb + H * wb                  # W1^T, v
        + (E + 2 * H) * 3 * H * wb             # GRU weights (E,3H)+(H,3H)+(H,3H)
        + 2 * 3 * H * f32                      # GRU biases
        + 2 * H * tn * wb + tn * f32           # classifier weight tiles + bias tile
        + (tb * S + tb * H + tb * tn) * f32    # outputs: attn, h_new, logits tile
    )
    scratch = 2 * tb * H * f32                 # ctx + h_new scratch
    return 2 * pipelined + scratch


def _choose_step_tiles(B, S, H, E, V, wb, budget):
    # Guarantee >= 2 programs on the parallel batch axis when B >= 16 (v7x: 2 TCs).
    tb_cands = _tile_candidates(B, (B // 2) if B >= 16 else None)
    tn_cands = _vocab_tile_candidates(V)
    for tb in tb_cands:
        for tn in tn_cands:
            if _fused_vmem_bytes(tb, tn, S, H, E, wb) <= budget:
                return tb, tn
    return tb_cands[-1], tn_cands[-1]


# ----------------------------------------------------------------------------
# Kernel 1: one-time encoder projection  enc_proj = enc @ W2^T + b_attn
#           (hoisted out of the per-step path; bias folded in here)
# ----------------------------------------------------------------------------
def _enc_proj_kernel(enc_ref, w2t_ref, b_ref, out_ref):
    proj = jnp.dot(enc_ref[...], w2t_ref[...],
                   preferred_element_type=jnp.float32) + b_ref[...]
    out_ref[...] = proj.astype(out_ref.dtype)


def precompute_encoder(params, encoder_outputs, weight_dtype=jnp.float32):
    """One-time per sequence: batch-first copy of enc and enc @ W2^T + bias.

    The (B,S,H)->(B*S,H) collapse happens in the XLA wrapper so the kernel
    only sees a plain 2-D matmul (no in-kernel reshape / sublane relayout).
    """
    S, B, H = encoder_outputs.shape
    wd = weight_dtype
    enc_bsh = jnp.transpose(encoder_outputs, (1, 0, 2)).astype(wd)   # (B, S, H)
    w2t = jnp.transpose(params["w_attn"][:, H:]).astype(wd)          # (H, H)
    b2d = params["b_attn"].reshape(1, H).astype(jnp.float32)

    M = B * S
    enc2d = enc_bsh.reshape(M, H)
    wb = jnp.dtype(wd).itemsize
    vmem_limit = _vmem_limit_bytes()
    budget = vmem_limit - (4 << 20)

    tm = M
    for cand in _tile_candidates(M, min(M, 2048)):
        tm = cand
        if 2 * (cand * H * wb * 2 + H * H * wb + H * 4) <= budget:
            break

    enc_proj = pl.pallas_call(
        _enc_proj_kernel,
        grid=(pl.cdiv(M, tm),),
        out_shape=jax.ShapeDtypeStruct((M, H), wd),
        in_specs=[pl.BlockSpec((tm, H), lambda i: (i, 0)),
                  pl.BlockSpec((H, H), lambda i: (0, 0)),
                  pl.BlockSpec((1, H), lambda i: (0, 0))],
        out_specs=pl.BlockSpec((tm, H), lambda i: (i, 0)),
        compiler_params=_compiler_params(("parallel",), vmem_limit),
    )(enc2d, w2t, b2d)
    return enc_bsh, enc_proj.reshape(B, S, H)


# ----------------------------------------------------------------------------
# Kernel 2: fused decode step (attention + context + GRU cell + classifier)
# ----------------------------------------------------------------------------
def _sigmoid(x):
    # tanh-based sigmoid: transcendental stays on the EUP, no divide
    return 0.5 * (jnp.tanh(0.5 * x) + 1.0)


def _mdot(x, w_ref):
    """MXU matmul against a (possibly bf16) weight ref, f32 accumulation."""
    w = w_ref[...]
    return jnp.dot(x.astype(w.dtype), w, preferred_element_type=jnp.float32)


def _decode_step_kernel(hid_ref, emb_ref, encp_ref, enc_ref,
                        w1t_ref, v_ref,
                        wie_ref, wic_ref, wh_ref, bi_ref, bh_ref,
                        wch_ref, wcc_ref, bc_ref,
                        attn_ref, hnew_ref, logits_ref,
                        ctx_s, hnew_s):
    nv = pl.program_id(1)
    H = hid_ref.shape[-1]

    # Attention + context + GRU run once per batch tile (first V tile only);
    # ctx / h_new are kept in VMEM scratch for the remaining V tiles.
    @pl.when(nv == 0)
    def _():
        hid = hid_ref[...]                                             # (tb, H) f32

        # --- Bahdanau attention (enc @ W2^T + b was precomputed) ---
        hid_proj = _mdot(hid, w1t_ref)                                 # (tb, H) f32
        e_in = encp_ref[...] + hid_proj[:, None, :].astype(encp_ref.dtype)
        energy = jnp.tanh(e_in)                                        # (tb, S, H)
        scores = jnp.sum((energy * v_ref[...][None, :, :]).astype(jnp.float32),
                         axis=-1)                                      # (tb, S) f32

        # softmax over S; approx reciprocal + 1 Newton step (full f32 accuracy)
        m = jnp.max(scores, axis=-1, keepdims=True)
        e = jnp.exp(scores - m)
        denom = jnp.sum(e, axis=-1, keepdims=True)
        inv = pl.reciprocal(denom, approx=True)
        inv = inv * (2.0 - denom * inv)
        attn = e * inv                                                 # (tb, S)
        attn_ref[...] = attn

        # context[b,:] = sum_s attn[b,s] * enc[b,s,:]  (stays in VMEM scratch)
        ctx = jnp.sum(attn[:, :, None] * enc_ref[...].astype(jnp.float32), axis=1)
        ctx_s[...] = ctx                                               # (tb, H)

        # --- GRU cell: 2 wide matmuls of N=3H, gates sliced at H boundaries ---
        gi = _mdot(emb_ref[...], wie_ref) + _mdot(ctx, wic_ref) + bi_ref[...]
        gh = _mdot(hid, wh_ref) + bh_ref[...]
        r = _sigmoid(gi[:, 0:H] + gh[:, 0:H])
        z = _sigmoid(gi[:, H:2 * H] + gh[:, H:2 * H])
        n = jnp.tanh(gi[:, 2 * H:3 * H] + r * gh[:, 2 * H:3 * H])
        h_new = (1.0 - z) * n + z * hid                                # (tb, H)
        hnew_s[...] = h_new
        hnew_ref[...] = h_new

    # --- classifier, streamed over V tiles (every grid step) ---
    logits_ref[...] = (_mdot(hnew_s[...], wch_ref)
                       + _mdot(ctx_s[...], wcc_ref)
                       + bc_ref[...])


def prepare_step_weights(params, embed_size, hidden_size, weight_dtype=jnp.float32):
    """One-time weight prep: split/transposed so the fused kernel never concats."""
    H, E = hidden_size, embed_size
    wd = weight_dtype
    w_attn, w_ih, w_hh, wc = (params["w_attn"], params["w_ih"],
                              params["w_hh"], params["wc"])
    return {
        "w1t": jnp.transpose(w_attn[:, :H]).astype(wd),                 # (H, H)
        "v2d": params["v"].reshape(1, H).astype(wd),                    # (1, H)
        "wi_e": jnp.transpose(w_ih[:, :E]).astype(wd),                  # (E, 3H)
        "wi_c": jnp.transpose(w_ih[:, E:]).astype(wd),                  # (H, 3H)
        "wh": jnp.transpose(w_hh).astype(wd),                           # (H, 3H)
        "bi": params["b_ih"].reshape(1, 3 * H).astype(jnp.float32),
        "bh": params["b_hh"].reshape(1, 3 * H).astype(jnp.float32),
        "wc_h": jnp.transpose(wc[:, :H]).astype(wd),                    # (H, V)
        "wc_c": jnp.transpose(wc[:, H:]).astype(wd),                    # (H, V)
        "bc": params["bc"].reshape(1, -1).astype(jnp.float32),          # (1, V)
    }


def _fused_decode_step(prepped, emb, hidden_bh, enc_bsh, enc_proj):
    B, H = hidden_bh.shape
    S = enc_bsh.shape[1]
    E = emb.shape[1]
    V = prepped["bc"].shape[1]
    wb = jnp.dtype(prepped["w1t"].dtype).itemsize

    vmem_limit = _vmem_limit_bytes()
    tb, tn = _choose_step_tiles(B, S, H, E, V, wb, vmem_limit - (4 << 20))
    grid = (pl.cdiv(B, tb), pl.cdiv(V, tn))

    # TODO(synk): pipeline_mode=pl.Buffered(1) on the constant-index weight
    # specs would halve their VMEM footprint; kept at the default double
    # buffering (fully accounted for in _fused_vmem_bytes) for portability.
    in_specs = [
        pl.BlockSpec((tb, H), lambda i, n: (i, 0)),           # hidden
        pl.BlockSpec((tb, E), lambda i, n: (i, 0)),           # embedding rows
        pl.BlockSpec((tb, S, H), lambda i, n: (i, 0, 0)),     # enc_proj (W2@enc + b)
        pl.BlockSpec((tb, S, H), lambda i, n: (i, 0, 0)),     # enc (batch-first)
        pl.BlockSpec((H, H), lambda i, n: (0, 0)),            # W1^T
        pl.BlockSpec((1, H), lambda i, n: (0, 0)),            # v
        pl.BlockSpec((E, 3 * H), lambda i, n: (0, 0)),        # W_ih (emb half)
        pl.BlockSpec((H, 3 * H), lambda i, n: (0, 0)),        # W_ih (ctx half)
        pl.BlockSpec((H, 3 * H), lambda i, n: (0, 0)),        # W_hh
        pl.BlockSpec((1, 3 * H), lambda i, n: (0, 0)),        # b_ih
        pl.BlockSpec((1, 3 * H), lambda i, n: (0, 0)),        # b_hh
        pl.BlockSpec((H, tn), lambda i, n: (0, n)),           # classifier W (h half)
        pl.BlockSpec((H, tn), lambda i, n: (0, n)),           # classifier W (ctx half)
        pl.BlockSpec((1, tn), lambda i, n: (0, n)),           # classifier bias
    ]
    out_specs = [
        pl.BlockSpec((tb, S), lambda i, n: (i, 0)),           # attention weights
        pl.BlockSpec((tb, H), lambda i, n: (i, 0)),           # new hidden state
        pl.BlockSpec((tb, tn), lambda i, n: (i, n)),          # logits (lane-dense tiles)
    ]
    out_shape = [
        jax.ShapeDtypeStruct((B, S), jnp.float32),
        jax.ShapeDtypeStruct((B, H), jnp.float32),
        jax.ShapeDtypeStruct((B, V), jnp.float32),
    ]
    attn, h_new, logits = pl.pallas_call(
        _decode_step_kernel,
        grid=grid,
        out_shape=out_shape,
        in_specs=in_specs,
        out_specs=out_specs,
        scratch_shapes=[pltpu.VMEM((tb, H), jnp.float32),     # ctx   (carried over V tiles)
                        pltpu.VMEM((tb, H), jnp.float32)],    # h_new (carried over V tiles)
        compiler_params=_compiler_params(("parallel", "arbitrary"), vmem_limit),
    )(hidden_bh, emb, enc_proj, enc_bsh,
      prepped["w1t"], prepped["v2d"],
      prepped["wi_e"], prepped["wi_c"], prepped["wh"],
      prepped["bi"], prepped["bh"],
      prepped["wc_h"], prepped["wc_c"], prepped["bc"])
    return logits, h_new, attn


# ----------------------------------------------------------------------------
# DecoderRNN forward (one decode step)
# ----------------------------------------------------------------------------
def decoder_rnn_forward(params, sequence, hidden, encoder_outputs,
                        weight_dtype=jnp.float32, precomputed=None, prepped=None):
    """Mirrors DecoderRNN.forward for n_layers == 1 (eval mode, no dropout)."""
    S, B, H = encoder_outputs.shape
    E = params["embedding"].shape[1]
    if prepped is None:
        prepped = prepare_step_weights(params, E, H, weight_dtype)
    if precomputed is None:
        precomputed = precompute_encoder(params, encoder_outputs, weight_dtype)
    enc_bsh, enc_proj = precomputed

    # TODO(synk): embedding row gather is data-dependent; kept as jnp.take in
    # XLA (could be moved in-kernel via scalar prefetch + pl.Element gather).
    emb = jnp.take(params["embedding"], sequence, axis=0)               # (B, E)
    # TODO(synk): nn.Dropout is identity in eval mode; training dropout not implemented.

    logits, h_new, attn = _fused_decode_step(prepped, emb, hidden[0], enc_bsh, enc_proj)
    return logits, h_new[None, :, :], attn[:, None, :]


# ----------------------------------------------------------------------------
# Pure-JAX reference mirroring the PyTorch forward exactly
# ----------------------------------------------------------------------------
def _reference_forward(params, sequence, hidden, encoder_outputs):
    S, B, H = encoder_outputs.shape
    emb = params["embedding"][sequence][None, :, :]                     # (1, B, E)

    h = jnp.transpose(hidden, (1, 0, 2))                                # (B, 1, H)
    h = jnp.tile(h, (1, S, 1))                                          # (B, S, H)
    enc = jnp.transpose(encoder_outputs, (1, 0, 2))                     # (B, S, H)
    cat = jnp.concatenate([h, enc], axis=2)                             # (B, S, 2H)
    energy = jnp.tanh(cat @ params["w_attn"].T + params["b_attn"])      # (B, S, H)
    energy = jnp.transpose(energy, (0, 2, 1))                           # (B, H, S)
    vv = jnp.tile(params["v"][None, :], (B, 1))[:, None, :]             # (B, 1, H)
    scores = jnp.matmul(vv, energy)[:, 0, :]                            # (B, S)
    attn = jax.nn.softmax(scores, axis=1)[:, None, :]                   # (B, 1, S)

    context = jnp.matmul(attn, enc)                                     # (B, 1, H)
    context = jnp.transpose(context, (1, 0, 2))                         # (1, B, H)
    dec_in = jnp.concatenate([emb, context], axis=2)                    # (1, B, E+H)

    x = dec_in[0]
    h0 = hidden[0]
    gi = x @ params["w_ih"].T + params["b_ih"]
    gh = h0 @ params["w_hh"].T + params["b_hh"]
    i_r, i_z, i_n = jnp.split(gi, 3, axis=1)
    h_r, h_z, h_n = jnp.split(gh, 3, axis=1)
    r = jax.nn.sigmoid(i_r + h_r)
    z = jax.nn.sigmoid(i_z + h_z)
    n = jnp.tanh(i_n + r * h_n)
    h_new = (1.0 - z) * n + z * h0                                      # (B, H)

    logits = (jnp.concatenate([h_new, context[0]], axis=1) @ params["wc"].T
              + params["bc"])
    return logits, h_new[None, :, :], attn


def init_params(key, vocab, embed, hidden):
    ks = jax.random.split(key, 10)
    lin_bound = 1.0 / math.sqrt(2 * hidden)
    stdv = 1.0 / math.sqrt(hidden)
    emb_table = jax.random.normal(ks[0], (vocab, embed), jnp.float32)
    emb_table = emb_table.at[1].set(0.0)                                # padding_idx = 1
    return {
        "embedding": emb_table,
        "w_attn": jax.random.uniform(ks[1], (hidden, 2 * hidden), jnp.float32, -lin_bound, lin_bound),
        "b_attn": jax.random.uniform(ks[2], (hidden,), jnp.float32, -lin_bound, lin_bound),
        "v": jax.random.uniform(ks[3], (hidden,), jnp.float32, -stdv, stdv),
        "w_ih": jax.random.uniform(ks[4], (3 * hidden, embed + hidden), jnp.float32, -stdv, stdv),
        "w_hh": jax.random.uniform(ks[5], (3 * hidden, hidden), jnp.float32, -stdv, stdv),
        "b_ih": jax.random.uniform(ks[6], (3 * hidden,), jnp.float32, -stdv, stdv),
        "b_hh": jax.random.uniform(ks[7], (3 * hidden,), jnp.float32, -stdv, stdv),
        "wc": jax.random.uniform(ks[8], (vocab, 2 * hidden), jnp.float32, -lin_bound, lin_bound),
        "bc": jax.random.uniform(ks[9], (vocab,), jnp.float32, -lin_bound, lin_bound),
    }


if __name__ == "__main__":
    B, S, H, E, V = 2, 8, 32, 16, 50

    key = jax.random.PRNGKey(0)
    k_par, k_seq, k_hid, k_enc = jax.random.split(key, 4)
    params = init_params(k_par, V, E, H)
    sequence = jax.random.randint(k_seq, (B,), 0, V)
    hidden = jax.random.normal(k_hid, (1, B, H), jnp.float32)
    encoder_outputs = jax.random.normal(k_enc, (S, B, H), jnp.float32)

    ref_logits, ref_h, ref_attn = _reference_forward(params, sequence, hidden,
                                                     encoder_outputs)

    # ---- f32 weights: numerically matches the PyTorch-equivalent reference ----
    prepped = prepare_step_weights(params, E, H, jnp.float32)
    precomp = precompute_encoder(params, encoder_outputs, jnp.float32)
    logits, h_new, attn = decoder_rnn_forward(params, sequence, hidden,
                                              encoder_outputs,
                                              weight_dtype=jnp.float32,
                                              precomputed=precomp, prepped=prepped)
    logits, h_new, attn = jax.block_until_ready((logits, h_new, attn))

    assert attn.shape == (B, 1, S), attn.shape
    assert h_new.shape == (1, B, H), h_new.shape
    assert logits.shape == (B, V), logits.shape
    assert jnp.allclose(attn, ref_attn, atol=1e-4, rtol=1e-4), \
        float(jnp.max(jnp.abs(attn - ref_attn)))
    assert jnp.allclose(h_new, ref_h, atol=1e-4, rtol=1e-4), \
        float(jnp.max(jnp.abs(h_new - ref_h)))
    assert jnp.allclose(logits, ref_logits, atol=1e-4, rtol=1e-4), \
        float(jnp.max(jnp.abs(logits - ref_logits)))
    assert jnp.allclose(jnp.sum(attn, axis=-1), 1.0, atol=1e-4)

    # ---- bf16 streamed weights (halves per-step HBM traffic); looser check ----
    prepped16 = prepare_step_weights(params, E, H, jnp.bfloat16)
    precomp16 = precompute_encoder(params, encoder_outputs, jnp.bfloat16)
    l16, h16, a16 = decoder_rnn_forward(params, sequence, hidden, encoder_outputs,
                                        weight_dtype=jnp.bfloat16,
                                        precomputed=precomp16, prepped=prepped16)
    l16, h16, a16 = jax.block_until_ready((l16, h16, a16))
    assert jnp.allclose(a16, ref_attn, atol=5e-2, rtol=5e-2), \
        float(jnp.max(jnp.abs(a16 - ref_attn)))
    assert jnp.allclose(h16, ref_h, atol=5e-2, rtol=5e-2), \
        float(jnp.max(jnp.abs(h16 - ref_h)))
    assert jnp.allclose(l16, ref_logits, atol=1e-1, rtol=1e-1), \
        float(jnp.max(jnp.abs(l16 - ref_logits)))

    print("KERNEL_OK")
</pallas_src>

<mosaic_0001>
module attributes {stable_mosaic.version = 11 : i64} {
  func.func @_enc_proj_kernel(%arg0: i32, %arg1: memref<16x32xf32, #tpu.memory_space<vmem>>, %arg2: memref<32x32xf32, #tpu.memory_space<vmem>>, %arg3: memref<1x32xf32, #tpu.memory_space<vmem>>, %arg4: memref<16x32xf32, #tpu.memory_space<vmem>>) attributes {dimension_semantics = [#tpu.dimension_semantics<parallel>], iteration_bounds = array<i64: 1>, scalar_prefetch = 0 : i64, scratch_operands = 0 : i64, tpu.core_type = #tpu.core_type<tc>, window_params = [{transform_indices = @transform_0, window_bounds = array<i64: 16, 32>}, {pipeline_mode = #tpu.pipeline_mode<synchronous>, transform_indices = @transform_1, window_bounds = array<i64: 32, 32>}, {pipeline_mode = #tpu.pipeline_mode<synchronous>, transform_indices = @transform_2, window_bounds = array<i64: 1, 32>}, {transform_indices = @transform_3, window_bounds = array<i64: 16, 32>}]} {
    %c0 = arith.constant 0 : index
    %c0_0 = arith.constant 0 : index
    %0 = vector.load %arg1[%c0, %c0_0] : memref<16x32xf32, #tpu.memory_space<vmem>>, vector<16x32xf32>
    %c0_1 = arith.constant 0 : index
    %c0_2 = arith.constant 0 : index
    %1 = vector.load %arg2[%c0_1, %c0_2] : memref<32x32xf32, #tpu.memory_space<vmem>>, vector<32x32xf32>
    %cst = arith.constant dense<0.000000e+00> : vector<16x32xf32>
    %2 = tpu.matmul %0, %1, %cst {dimension_numbers = #tpu.dot_dimension_numbers<[1], [0], [0], [1], [0, 0, 1, 1], [], []>} : vector<16x32xf32>, vector<32x32xf32>, vector<16x32xf32> -> vector<16x32xf32>
    %c0_3 = arith.constant 0 : index
    %c0_4 = arith.constant 0 : index
    %3 = vector.load %arg3[%c0_3, %c0_4] : memref<1x32xf32, #tpu.memory_space<vmem>>, vector<1x32xf32>
    %4 = vector.broadcast %3 : vector<1x32xf32> to vector<16x32xf32>
    %5 = arith.addf %2, %4 : vector<16x32xf32>
    %c0_5 = arith.constant 0 : index
    %c0_6 = arith.constant 0 : index
    %6 = vector.load %arg4[%c0_5, %c0_6] : memref<16x32xf32, #tpu.memory_space<vmem>>, vector<16x32xf32>
    tpu.vector_store %arg4[%c0_5, %c0_6], %5 {strides = array<i32>} : memref<16x32xf32, #tpu.memory_space<vmem>>, vector<16x32xf32>,
    return
  }
  func.func @transform_0(%arg0: i32) -> (i32, i32) {
    %c0_i32 = arith.constant 0 : i32
    %c0_i32_0 = arith.constant 0 : i32
    return %arg0, %c0_i32 : i32, i32
  }
  func.func @transform_1(%arg0: i32) -> (i32, i32) {
    %c0_i32 = arith.constant 0 : i32
    %c0_i32_0 = arith.constant 0 : i32
    %c0_i32_1 = arith.constant 0 : i32
    return %c0_i32, %c0_i32_0 : i32, i32
  }
  func.func @transform_2(%arg0: i32) -> (i32, i32) {
    %c0_i32 = arith.constant 0 : i32
    %c0_i32_0 = arith.constant 0 : i32
    %c0_i32_1 = arith.constant 0 : i32
    return %c0_i32, %c0_i32_0 : i32, i32
  }
  func.func @transform_3(%arg0: i32) -> (i32, i32) {
    %c0_i32 = arith.constant 0 : i32
    %c0_i32_0 = arith.constant 0 : i32
    return %arg0, %c0_i32 : i32, i32
  }
}

</mosaic_0001>

<bundles_post_ra>
// kernel: tpu_custom_call.1
= control target key start
LH: loop header
LB: loop body
LE: loop exit
PB: predicated region body
PF: predicated region fallthrough
CT: control target
= control target key end

     0   :  { %8 = vsyncpa [#allocation3], 0  ;;  %s340_s0 = inlined_call_operand.hbm [shape: f32[16,32], index: 0, kind: input, shape index: {}]   ;;  %s341_s1 = inlined_call_operand.hbm [shape: f32[32,32], index: 1, kind: input, shape index: {}]   ;;  %s342_s2 = inlined_call_operand.vmem [shape: f32[1,32], index: 2, kind: input, shape index: {}]   ;;  %s343_s3 = inlined_call_operand.hbm [shape: f32[16,32], index: 3, kind: output, shape index: {}]  }
   0x1   :  { %9 = vsyncpa [#allocation6], 0 }
   0x2   :  { %10 = vsyncpa [#allocation4], 0  ;;  %s263_s12 = smov [#allocation2]   ;;  %s191_s16 = scalar_lea.hbm %s340_s0, 256 }
   0x3   :  { %s16_s13 = sshll.u32 %s263_s12, 4  ;;  %p192_p0 = scmp.ne.s32.totalorder %s340_s0, %s191_s16  ;;  %s17_s13 = int_to_ptr.vmem [resolvable:$true] %s16_s13 }
   0x4   :  { %p195_p1 = scmp.lt.u32.totalorder %s191_s16, %s340_s0 }
   0x6   :  { %p197_p2 = pnand %p195_p1, %p192_p0 }
   0x8   :  { %200 = shalt.err (!%p197_p2)
}
   0x9   :  { %s201_s21 = scalar_lea.vmem %s17_s13, 256  ;;  %p206_p4 = scmp.lt.s32.totalorder %s17_s13, %s17_s13 }
   0xa   :  { %p202_p3 = scmp.ne.s32.totalorder %s17_s13, %s201_s21  ;;  %p207_p5 = scmp.lt.s32.totalorder %s201_s21, %s201_s21 }
   0xc   :  { %p208_p6 = por %p207_p5, %p206_p4 }
   0xe   :  { %p209_p7 = pnand %p208_p6, %p202_p3 }
  0x10   :  { %212 = shalt.err (!%p209_p7)
}
  0x11   :  { %s264_s22 = smov 128   ;;  %s265_s23 = smov 8  }
  0x12   :  { %22 = dma.hbm_to_vmem [thread:$0]  %s340_s0, 256, %s17_s13, [#allocation3], %s264_s22, %s264_s22, %s265_s23  }
  0x13   :  { %s266_s26 = smov [#allocation5]   ;;  %s213_s30 = scalar_lea.hbm %s341_s1, 512 }
  0x14   :  { %s28_s27 = sshll.u32 %s266_s26, 4  ;;  %p214_p8 = scmp.ne.s32.totalorder %s341_s1, %s213_s30  ;;  %s29_s27 = int_to_ptr.vmem [resolvable:$true] %s28_s27 }
  0x15   :  { %p217_p9 = scmp.lt.u32.totalorder %s213_s30, %s341_s1 }
  0x17   :  { %p219_p10 = pnand %p217_p9, %p214_p8 }
  0x19   :  { %222 = shalt.err (!%p219_p10)
}
  0x1a   :  { %s223_s8 = scalar_lea.vmem %s29_s27, 512  ;;  %p228_p12 = scmp.lt.s32.totalorder %s29_s27, %s29_s27 }
  0x1b   :  { %p224_p11 = scmp.ne.s32.totalorder %s29_s27, %s223_s8  ;;  %p229_p13 = scmp.lt.s32.totalorder %s223_s8, %s223_s8 }
  0x1d   :  { %p230_p0 = por %p229_p13, %p228_p12 }
  0x1f   :  { %p231_p1 = pnand %p230_p0, %p224_p11 }
  0x21   :  { %234 = shalt.err (!%p231_p1)
}
  0x22   :  { %34 = dma.hbm_to_vmem [thread:$0]  %s341_s1, 512, %s29_s27, [#allocation6], %s264_s22, %s264_s22, %s265_s23  }
  0x23   :  { %257 = dma.done.wait [#allocation3], 256  }
  0x24   :  { %258 = vsyncadd [#allocation3], 4294967040 }
  0x25   :  { %259 = dma.done.wait [#allocation6], 512  }
  0x26   :  { %260 = vsyncadd [#allocation6], 4294966784  ;;  %vm56_vm0 = vcmask 261120   ;;  %v45_v0 = vld [vmem:[#allocation5] sm:$0xff]  ;;  %v46_v1 = vld [vmem:[#allocation5 + $0x8] sm:$0xff]  ;;  %s267_s11 = smov [#allocation7]  }
  0x27   :  { %v47_v2 = vld [vmem:[#allocation5 + $0x10] sm:$0xff]  ;;  %v178_v3 = vpack.c.bf16 %v46_v1, %v45_v0  ;;  %v48_v4 = vld [vmem:[#allocation5 + $0x18] sm:$0xff]  ;;  %s145_s12 = sshll.u32 %s267_s11, 4  ;;  %s146_s12 = int_to_ptr.vmem [resolvable:$true] %s145_s12 }
  0x28   :  { %v43_v5 = vld [vmem:[#allocation2] sm:$0xff]  ;;  %v182_v6 = vpack.c.bf16 %v48_v4, %v47_v2  ;;  %v44_v7 = vld [vmem:[#allocation2 + $0x8] sm:$0xff]  ;;  %s235_s13 = scalar_lea.vmem %s146_s12, 256  ;;  %p240_p3 = scmp.lt.s32.totalorder %s146_s12, %s146_s12 }
  0x29   :  { %175 = vmatprep.mubr.msk.f32.mxu0 %vm56_vm0, %v43_v5  ;;  %179 = vmatprep.subr.bf16.mxu0 %v178_v3  ;;  %v158_v8 = vld [vmem:[%s342_s2] ss:$0 sm:$0xff]  ;;  %p236_p2 = scmp.ne.s32.totalorder %s146_s12, %s235_s13  ;;  %p241_p4 = scmp.lt.s32.totalorder %s235_s13, %s235_s13 }
  0x2a   :  { %181 = vmatpush3.bf16.msra.mxu0 %v178_v3 }
  0x2b   :  { %183 = vmatprep.subr.bf16.mxu0 %v182_v6  ;;  %p242_p5 = por %p241_p4, %p240_p3 }
  0x2d   :  { %p243_p6 = pnand %p242_p5, %p236_p2 }
  0x2e   :  { %185 = vmatpush3.bf16.msra.mxu0 %v182_v6 }
  0x31   :  { %176 = vmatmul.mubr.msk.f32.vlgmr.msra.gmra.mrb[0].mxu0 %vm56_vm0, %v44_v7 }
 0x104   :  { %v177_v9 = vpop.f32.mrb[0].mxu0 }
 0x105   :  { %v135_v10 = vadd.f32 %v177_v9, %v158_v8  ;;  %v129_v11 = vpop.f32.mrb[1].mxu0 }
 0x106   :  { %v130_v12 = vadd.f32 %v158_v8, %v129_v11 }
 0x107   :  { %139 = vst.msk [vmem:[#allocation7 + $0x8] sm:$0xff] %vm56_vm0, %v135_v10 }
 0x108   :  { %138 = vst.msk [vmem:[#allocation7] sm:$0xff] %vm56_vm0, %v130_v12 }
 0x109   :  { %246 = shalt.err (!%p243_p6)
}
 0x10a   :  { %s247_s15 = scalar_lea.hbm %s343_s3, 256 }
 0x10b   :  { %p248_p7 = scmp.ne.s32.totalorder %s343_s3, %s247_s15  ;;  %p251_p8 = scmp.lt.u32.totalorder %s247_s15, %s343_s3 }
 0x10d   :  { %p253_p9 = pnand %p251_p8, %p248_p7 }
 0x10f   :  { %256 = shalt.err (!%p253_p9)
}
 0x110   :  { %151 = dma.vmem_to_hbm [thread:$0]  %s146_s12, 256, %s343_s3, [#allocation4], %s264_s22, %s264_s22, %s265_s23  }
 0x111   :  { %261 = dma.done.wait [#allocation4], 256  }
 0x112   :  { %262 = vsyncadd [#allocation4], 4294967040 }
 0x113   :  { %155 = vsyncpa [#allocation3], 1 }
 0x114   :  { %156 = vsyncpa [#allocation6], 1 }
 0x115   :  { %157 = vsyncpa [#allocation4], 1 }

</bundles_post_ra>
